<compile_context>
chip_gen: v5e
topology: v5e:2x2
jax: 0.10.0
libtpu: 0.0.40
codegen_flags: <defaults>
</compile_context>

<pallas_src>
import jax
import jax.numpy as jnp
import numpy as np
from jax.experimental import pallas as pl
from jax.experimental.pallas import tpu as pltpu


def _mymodel_kernel(x_ref, w_ref, b_ref, lab_ref, loss_ref, prob_ref, pred_ref):
    # --- Linear(768, num_labels): bf16 MXU matmul, f32 accumulation, f32 bias ---
    x = x_ref[...].astype(jnp.bfloat16)                               # (B, D) bf16
    w = w_ref[...]                                                    # (D, L) bf16
    b = b_ref[...]                                                    # (1, L) f32
    logits = jnp.dot(x, w, preferred_element_type=jnp.float32) + b    # (B, L) f32

    # --- numerically stable softmax (dim=-1), all math in f32 ---
    m = jnp.max(logits, axis=-1, keepdims=True)                       # (B, 1)
    e = jnp.exp(logits - m)                                           # (B, L)
    s = jnp.sum(e, axis=-1, keepdims=True)                            # (B, 1)
    prob_ref[...] = e * pl.reciprocal(s, approx=True)                 # EUP vrcp

    # --- cross entropy (mean over batch) from log-sum-exp ---
    logz = m + jnp.log(s)                                             # (B, 1)
    labels = lab_ref[...]                                             # (B, 1) i32
    class_ids = jax.lax.broadcasted_iota(jnp.int32, logits.shape, 1)  # (B, L)
    # fused onehot-select + reduce (no materialized onehot array)
    picked = jnp.sum(jnp.where(class_ids == labels, logits, 0.0),
                     axis=-1, keepdims=True)                          # (B, 1)
    nll = logz - picked                                               # (B, 1)
    loss_ref[0, 0] = jnp.sum(nll) / jnp.float32(logits.shape[0])      # SMEM scalar

    # --- argmax over classes (ties -> lowest index); reuse the logits row-max ---
    cand = jnp.where(logits >= m, class_ids, logits.shape[-1])
    pred_ref[...] = jnp.min(cand, axis=-1, keepdims=True).astype(jnp.int32)


def prepare_classifier_params(w_t, b):
    """One-time parameter prep (do this at model init, NOT per forward call).

    w_t: (768, L) classifier weight in (in, out) layout; b: (L,) bias.
    Returns (w_bf16, b_f32_2d) ready to feed straight into the kernel.
    """
    w_bf16 = w_t.astype(jnp.bfloat16)                 # halves the dominant DMA
    b_f32 = b.astype(jnp.float32).reshape(1, -1)      # bias / softmax math stay f32
    return w_bf16, b_f32


def mymodel_forward(x, w_bf16, b_f32, labels):
    """x: (B, 768) bert pooled output; w_bf16: (768, L) bf16; b_f32: (1, L) f32;
    labels: (B,) int32 with 0 <= label < L (no in-kernel range guard)."""
    B, D = x.shape
    L = w_bf16.shape[1]
    lab2 = labels.reshape(B, 1).astype(jnp.int32)

    bytes_accessed = (x.size * x.dtype.itemsize      # x
                      + w_bf16.size * 2              # weight (bf16)
                      + b_f32.size * 4               # bias
                      + lab2.size * 4                # labels
                      + 4                            # loss
                      + B * L * 4                    # prob
                      + B * 4)                       # pred

    loss, prob, pred = pl.pallas_call(
        _mymodel_kernel,
        # No grid: single full-array block (exempt from the (8,128) rule),
        # no pipeline bookkeeping at B=8.
        in_specs=[
            pl.BlockSpec(memory_space=pltpu.MemorySpace.VMEM),   # x
            pl.BlockSpec(memory_space=pltpu.MemorySpace.VMEM),   # w
            pl.BlockSpec(memory_space=pltpu.MemorySpace.VMEM),   # b
            pl.BlockSpec(memory_space=pltpu.MemorySpace.VMEM),   # labels
        ],
        out_specs=[
            pl.BlockSpec(memory_space=pltpu.MemorySpace.SMEM),   # loss scalar
            pl.BlockSpec(memory_space=pltpu.MemorySpace.VMEM),   # prob
            pl.BlockSpec(memory_space=pltpu.MemorySpace.VMEM),   # pred
        ],
        out_shape=[
            jax.ShapeDtypeStruct((1, 1), jnp.float32),
            jax.ShapeDtypeStruct((B, L), jnp.float32),
            jax.ShapeDtypeStruct((B, 1), jnp.int32),
        ],
        cost_estimate=pl.CostEstimate(
            flops=2 * B * D * L,
            transcendentals=B * L,
            bytes_accessed=bytes_accessed,
        ),
    )(x, w_bf16, b_f32, lab2)

    return loss[0, 0], prob, pred[:, 0]


if __name__ == "__main__":
    # Small shapes consistent with the module: hidden=768 (fixed by Linear(768, .)),
    # batch=8, num_labels=32.
    B, D, L = 8, 768, 32

    key = jax.random.PRNGKey(0)
    kx, kw, kb, kl = jax.random.split(key, 4)

    # TODO(synk): the BERT sentence encoder is an external module; we model its
    # pooled output directly as the kernel input.
    x = jax.random.normal(kx, (B, D), dtype=jnp.float32)

    # classifier_ = nn.Linear(768, num_labels): torch stores weight as (out, in);
    # we keep the transposed (in, out) layout for the kernel.
    bound = 1.0 / np.sqrt(D)
    w_t = jax.random.uniform(kw, (D, L), minval=-bound, maxval=bound,
                             dtype=jnp.float32)
    b = jax.random.uniform(kb, (L,), minval=-bound, maxval=bound,
                           dtype=jnp.float32)
    labels = jax.random.randint(kl, (B,), 0, L, dtype=jnp.int32)

    # One-time parameter prep (hoisted out of the per-call path).
    w_bf16, b_f32 = prepare_classifier_params(w_t, b)
    w_bf16, b_f32 = jax.block_until_ready((w_bf16, b_f32))

    loss, prob, pred = mymodel_forward(x, w_bf16, b_f32, labels)
    jax.block_until_ready((loss, prob, pred))

    # Pure-JAX reference following the same precision path (bf16 MXU inputs,
    # f32 accumulation / bias / softmax), so only the approximate reciprocal
    # and accumulation order differ.
    logits_ref = jnp.dot(x.astype(jnp.bfloat16), w_bf16,
                         preferred_element_type=jnp.float32) + b_f32
    prob_ref = jax.nn.softmax(logits_ref, axis=-1)
    loss_ref = -jnp.mean(
        jax.nn.log_softmax(logits_ref, axis=-1)[jnp.arange(B), labels])
    pred_ref = jnp.argmax(prob_ref, axis=-1)

    assert np.allclose(np.asarray(prob), np.asarray(prob_ref), atol=2e-3)
    assert np.allclose(float(loss), float(loss_ref), atol=1e-3)
    assert np.array_equal(np.asarray(pred), np.asarray(pred_ref))

    # Sanity check against the full-f32 torch semantics (looser, bf16 weight cast).
    logits_f32 = x @ w_t + b
    assert np.allclose(np.asarray(prob), np.asarray(jax.nn.softmax(logits_f32, -1)),
                       atol=2e-2)

    print("KERNEL_OK")
</pallas_src>

<mosaic_0001>
module attributes {stable_mosaic.version = 11 : i64} {
  func.func @_mymodel_kernel(%arg0: memref<8x768xf32, #tpu.memory_space<vmem>>, %arg1: memref<768x32xbf16, #tpu.memory_space<vmem>>, %arg2: memref<1x32xf32, #tpu.memory_space<vmem>>, %arg3: memref<8x1xi32, #tpu.memory_space<vmem>>, %arg4: memref<1x1xf32, #tpu.memory_space<smem>>, %arg5: memref<8x32xf32, #tpu.memory_space<vmem>>, %arg6: memref<8x1xi32, #tpu.memory_space<vmem>>) attributes {dimension_semantics = [], scalar_prefetch = 0 : i64, scratch_operands = 0 : i64, tpu.core_type = #tpu.core_type<tc>} {
    %c0 = arith.constant 0 : index
    %c0_0 = arith.constant 0 : index
    %0 = vector.load %arg0[%c0, %c0_0] : memref<8x768xf32, #tpu.memory_space<vmem>>, vector<8x768xf32>
    %1 = arith.truncf %0 : vector<8x768xf32> to vector<8x768xbf16>
    %c0_1 = arith.constant 0 : index
    %c0_2 = arith.constant 0 : index
    %2 = vector.load %arg1[%c0_1, %c0_2] : memref<768x32xbf16, #tpu.memory_space<vmem>>, vector<768x32xbf16>
    %c0_3 = arith.constant 0 : index
    %c0_4 = arith.constant 0 : index
    %3 = vector.load %arg2[%c0_3, %c0_4] : memref<1x32xf32, #tpu.memory_space<vmem>>, vector<1x32xf32>
    %cst = arith.constant dense<0.000000e+00> : vector<8x32xf32>
    %4 = tpu.matmul %1, %2, %cst {dimension_numbers = #tpu.dot_dimension_numbers<[1], [0], [0], [1], [0, 0, 1, 1], [], []>} : vector<8x768xbf16>, vector<768x32xbf16>, vector<8x32xf32> -> vector<8x32xf32>
    %5 = vector.broadcast %3 : vector<1x32xf32> to vector<8x32xf32>
    %6 = arith.addf %4, %5 : vector<8x32xf32>
    %cst_5 = arith.constant dense<0xFF800000> : vector<8xf32>
    %7 = vector.multi_reduction <maximumf>, %6, %cst_5 [1] : vector<8x32xf32> to vector<8xf32>
    %8 = vector.shape_cast %7 : vector<8xf32> to vector<8x1xf32>
    %9 = vector.broadcast %8 : vector<8x1xf32> to vector<8x32xf32>
    %10 = arith.subf %6, %9 : vector<8x32xf32>
    %11 = math.exp %10 : vector<8x32xf32>
    %cst_6 = arith.constant dense<0.000000e+00> : vector<8xf32>
    %12 = vector.multi_reduction <add>, %11, %cst_6 [1] : vector<8x32xf32> to vector<8xf32>
    %13 = vector.shape_cast %12 : vector<8xf32> to vector<8x1xf32>
    %14 = tpu.reciprocal %13 {approx = true} : vector<8x1xf32> -> vector<8x1xf32>
    %15 = vector.broadcast %14 : vector<8x1xf32> to vector<8x32xf32>
    %16 = arith.mulf %11, %15 : vector<8x32xf32>
    %c0_7 = arith.constant 0 : index
    %c0_8 = arith.constant 0 : index
    %17 = vector.load %arg5[%c0_7, %c0_8] : memref<8x32xf32, #tpu.memory_space<vmem>>, vector<8x32xf32>
    tpu.vector_store %arg5[%c0_7, %c0_8], %16 {strides = array<i32>} : memref<8x32xf32, #tpu.memory_space<vmem>>, vector<8x32xf32>,
    %18 = math.log %13 : vector<8x1xf32>
    %19 = arith.addf %8, %18 : vector<8x1xf32>
    %c0_9 = arith.constant 0 : index
    %c0_10 = arith.constant 0 : index
    %20 = vector.load %arg3[%c0_9, %c0_10] : memref<8x1xi32, #tpu.memory_space<vmem>>, vector<8x1xi32>
    %21 = tpu.iota {dimensions = array<i32: 1>} : vector<8x32xi32>
    %22 = vector.broadcast %20 : vector<8x1xi32> to vector<8x32xi32>
    %23 = arith.cmpi eq, %21, %22 : vector<8x32xi32>
    %cst_11 = arith.constant 0.000000e+00 : f32
    %24 = vector.broadcast %cst_11 : f32 to vector<8x32xf32>
    %25 = arith.select %23, %6, %24 : vector<8x32xi1>, vector<8x32xf32>
    %cst_12 = arith.constant dense<0.000000e+00> : vector<8xf32>
    %26 = vector.multi_reduction <add>, %25, %cst_12 [1] : vector<8x32xf32> to vector<8xf32>
    %27 = vector.shape_cast %26 : vector<8xf32> to vector<8x1xf32>
    %28 = arith.subf %19, %27 : vector<8x1xf32>
    %29 = vector.shape_cast %28 : vector<8x1xf32> to vector<1x8x1xf32>
    %cst_13 = arith.constant dense<0.000000e+00> : vector<1xf32>
    %30 = vector.multi_reduction <add>, %29, %cst_13 [1, 2] : vector<1x8x1xf32> to vector<1xf32>
    %31 = vector.shape_cast %30 : vector<1xf32> to vector<1x1x1xf32>
    %32 = vector.extract %31[0, 0, 0] : f32 from vector<1x1x1xf32>
    %cst_14 = arith.constant 8.000000e+00 : f32
    %33 = arith.divf %32, %cst_14 : f32
    %c0_15 = arith.constant 0 : index
    %c0_16 = arith.constant 0 : index
    %34 = memref.load %arg4[%c0_15, %c0_16] : memref<1x1xf32, #tpu.memory_space<smem>>
    memref.store %33, %arg4[%c0_15, %c0_16] : memref<1x1xf32, #tpu.memory_space<smem>>
    %35 = vector.broadcast %8 : vector<8x1xf32> to vector<8x32xf32>
    %36 = arith.cmpf oge, %6, %35 : vector<8x32xf32>
    %c32_i32 = arith.constant 32 : i32
    %37 = vector.broadcast %c32_i32 : i32 to vector<8x32xi32>
    %38 = arith.select %36, %21, %37 : vector<8x32xi1>, vector<8x32xi32>
    %cst_17 = arith.constant dense<2147483647> : vector<8xi32>
    %39 = vector.multi_reduction <minsi>, %38, %cst_17 [1] : vector<8x32xi32> to vector<8xi32>
    %40 = vector.shape_cast %39 : vector<8xi32> to vector<8x1xi32>
    %c0_18 = arith.constant 0 : index
    %c0_19 = arith.constant 0 : index
    %41 = vector.load %arg6[%c0_18, %c0_19] : memref<8x1xi32, #tpu.memory_space<vmem>>, vector<8x1xi32>
    tpu.vector_store %arg6[%c0_18, %c0_19], %40 {strides = array<i32>} : memref<8x1xi32, #tpu.memory_space<vmem>>, vector<8x1xi32>,
    return
  }
}

</mosaic_0001>

<bundles_post_ra>
// kernel: tpu_custom_call.1
= control target key start
LH: loop header
LB: loop body
LE: loop exit
PB: predicated region body
PF: predicated region fallthrough
CT: control target
= control target key end

     0   :  { %12 = vsyncpa [#allocation4], 0  ;;  %s1124_s0 = inlined_call_operand.vmem [shape: f32[8,768], index: 0, kind: input, shape index: {}]   ;;  %s1125_s1 = inlined_call_operand.vmem [shape: bf16[768,32], index: 1, kind: input, shape index: {}]   ;;  %s1126_s2 = inlined_call_operand.vmem [shape: f32[1,32], index: 2, kind: input, shape index: {}]   ;;  %s1127_s3 = inlined_call_operand.vmem [shape: s32[8,1], index: 3, kind: input, shape index: {}]   ;;  %s1128_s4 = inlined_call_operand.hbm [shape: f32[1,1], index: 4, kind: output, shape index: {0}]   ;;  %s1129_s5 = inlined_call_operand.hbm [shape: f32[8,32], index: 5, kind: output, shape index: {1}]   ;;  %s1130_s6 = inlined_call_operand.vmem [shape: s32[8,1], index: 6, kind: output, shape index: {2}]  }
   0x1   :  { %v802_v0 = vld [vmem:[%s1125_s1 + $0x38] sm:$0xff]  ;;  %v801_v2 = vld [vmem:[%s1125_s1 + $0x30] sm:$0xff]  ;;  %v800_v8 = vld [vmem:[%s1125_s1 + $0x28] sm:$0xff] }
   0x2   :  { %v810_v1 = vld [vmem:[%s1125_s1 + $0x78] sm:$0xff]  ;;  %422 = vmatpush.bf16.msra.mxu0 %v802_v0  ;;  %v809_v3 = vld [vmem:[%s1125_s1 + $0x70] sm:$0xff]  ;;  %v808_v9 = vld [vmem:[%s1125_s1 + $0x68] sm:$0xff] }
   0x3   :  { %435 = vmatpush.bf16.msra.mxu1 %v810_v1  ;;  %v818_v4 = vld [vmem:[%s1125_s1 + $0xb8] sm:$0xff]  ;;  %v817_v6 = vld [vmem:[%s1125_s1 + $0xb0] sm:$0xff]  ;;  %v816_v10 = vld [vmem:[%s1125_s1 + $0xa8] sm:$0xff] }
   0x4   :  { %v826_v5 = vld [vmem:[%s1125_s1 + $0xf8] sm:$0xff]  ;;  %448 = vmatpush.bf16.msra.mxu2 %v818_v4  ;;  %v825_v7 = vld [vmem:[%s1125_s1 + $0xf0] sm:$0xff]  ;;  %v824_v11 = vld [vmem:[%s1125_s1 + $0xe8] sm:$0xff] }
   0x5   :  { %461 = vmatpush.bf16.msra.mxu3 %v826_v5  ;;  %v799_v12 = vld [vmem:[%s1125_s1 + $0x20] sm:$0xff]  ;;  %v798_v16 = vld [vmem:[%s1125_s1 + $0x18] sm:$0xff] }
   0x6   :  { %423 = vmatpush.bf16.msra.mxu0 %v801_v2  ;;  %v807_v13 = vld [vmem:[%s1125_s1 + $0x60] sm:$0xff]  ;;  %v806_v17 = vld [vmem:[%s1125_s1 + $0x58] sm:$0xff] }
   0x7   :  { %436 = vmatpush.bf16.msra.mxu1 %v809_v3  ;;  %v815_v14 = vld [vmem:[%s1125_s1 + $0xa0] sm:$0xff]  ;;  %v814_v18 = vld [vmem:[%s1125_s1 + $0x98] sm:$0xff] }
   0x8   :  { %449 = vmatpush.bf16.msra.mxu2 %v817_v6  ;;  %v823_v15 = vld [vmem:[%s1125_s1 + $0xe0] sm:$0xff] }
   0x9   :  { %462 = vmatpush.bf16.msra.mxu3 %v825_v7 }
   0xa   :  { %424 = vmatpush.bf16.msra.mxu0 %v800_v8 }
   0xb   :  { %437 = vmatpush.bf16.msra.mxu1 %v808_v9 }
   0xc   :  { %450 = vmatpush.bf16.msra.mxu2 %v816_v10 }
   0xd   :  { %463 = vmatpush.bf16.msra.mxu3 %v824_v11 }
   0xe   :  { %425 = vmatpush.bf16.msra.mxu0 %v799_v12 }
   0xf   :  { %438 = vmatpush.bf16.msra.mxu1 %v807_v13 }
  0x10   :  { %451 = vmatpush.bf16.msra.mxu2 %v815_v14 }
  0x11   :  { %13 = vsyncpa [#allocation3], 0  ;;  %464 = vmatpush.bf16.msra.mxu3 %v823_v15  ;;  %v822_v19 = vld [vmem:[%s1125_s1 + $0xd8] sm:$0xff]  ;;  %v797_v20 = vld [vmem:[%s1125_s1 + $0x10] sm:$0xff]  ;;  %v901_v62 = vmov 0   ;;  %vm500_vm0 = vcmask 261120  }
  0x12   :  { %426 = vmatpush.bf16.msra.mxu0 %v798_v16  ;;  %v805_v21 = vld [vmem:[%s1125_s1 + $0x50] sm:$0xff]  ;;  %v796_v24 = vld [vmem:[%s1125_s1 + $0x8] sm:$0xff]  ;;  %v795_v27 = vld [vmem:[%s1125_s1] sm:$0xff]  ;;  %851 = vset.pattern.permute.xlu0 %v901_v62  ;;  %vm528_vm3 = vcmask 7168   ;;  %s584_s13 = sshll.u32 %s1129_s5, 4  ;;  %s573_s5 = sshll.u32 %s1128_s4, 4  ;;  %s585_s13 = int_to_ptr.hbm [resolvable:$true] %s584_s13  ;;  %s574_s5 = int_to_ptr.hbm [resolvable:$true] %s573_s5 }
  0x13   :  { %439 = vmatpush.bf16.msra.mxu1 %v806_v17  ;;  %v813_v22 = vld [vmem:[%s1125_s1 + $0x90] sm:$0xff]  ;;  %v804_v25 = vld [vmem:[%s1125_s1 + $0x48] sm:$0xff]  ;;  %v803_v29 = vld [vmem:[%s1125_s1 + $0x40] sm:$0xff]  ;;  %s904_s19 = smov [#allocation2]  }
  0x14   :  { %452 = vmatpush.bf16.msra.mxu2 %v814_v18  ;;  %v821_v23 = vld [vmem:[%s1125_s1 + $0xd0] sm:$0xff]  ;;  %v812_v26 = vld [vmem:[%s1125_s1 + $0x88] sm:$0xff]  ;;  %v22_v30 = vld [vmem:[%s1124_s0] sm:$0xff] }
  0x15   :  { %465 = vmatpush.bf16.msra.mxu3 %v822_v19  ;;  %v820_v28 = vld [vmem:[%s1125_s1 + $0xc8] sm:$0xff]  ;;  %v834_v32 = vld [vmem:[%s1125_s1 + $0x138] sm:$0xff]  ;;  %v811_v34 = vld [vmem:[%s1125_s1 + $0x80] sm:$0xff]  ;;  %v28_v35 = vpack.c.bf16 %v22_v30, %v22_v30 }
  0x16   :  { %427 = vmatpush.bf16.msra.mxu0 %v797_v20  ;;  %v23_v31 = vld [vmem:[%s1124_s0 + $0x8] sm:$0xff]  ;;  %v842_v33 = vld [vmem:[%s1125_s1 + $0x178] sm:$0xff]  ;;  %v24_v37 = vld [vmem:[%s1124_s0 + $0x10] sm:$0xff] }
  0x17   :  { %440 = vmatpush.bf16.msra.mxu1 %v805_v21  ;;  %v29_v36 = vpack.c.bf16 %v23_v31, %v23_v31  ;;  %v819_v38 = vld [vmem:[%s1125_s1 + $0xc0] sm:$0xff]  ;;  %v25_v39 = vld [vmem:[%s1124_s0 + $0x18] sm:$0xff]  ;;  %v833_v40 = vld [vmem:[%s1125_s1 + $0x130] sm:$0xff]  ;;  %v30_v42 = vpack.c.bf16 %v24_v37, %v24_v37 }
  0x18   :  { %453 = vmatpush.bf16.msra.mxu2 %v813_v22  ;;  %v841_v41 = vld [vmem:[%s1125_s1 + $0x170] sm:$0xff]  ;;  %v31_v43 = vpack.c.bf16 %v25_v39, %v25_v39  ;;  %v832_v44 = vld [vmem:[%s1125_s1 + $0x128] sm:$0xff]  ;;  %v831_v46 = vld [vmem:[%s1125_s1 + $0x120] sm:$0xff] }
  0x19   :  { %466 = vmatpush.bf16.msra.mxu3 %v821_v23  ;;  %v840_v45 = vld [vmem:[%s1125_s1 + $0x168] sm:$0xff]  ;;  %v839_v47 = vld [vmem:[%s1125_s1 + $0x160] sm:$0xff]  ;;  %v830_v48 = vld [vmem:[%s1125_s1 + $0x118] sm:$0xff]  ;;  %v517_v23 = vlaneseq }
  0x1a   :  { %428 = vmatpush.bf16.msra.mxu0 %v796_v24  ;;  %v838_v49 = vld [vmem:[%s1125_s1 + $0x158] sm:$0xff]  ;;  %v829_v50 = vld [vmem:[%s1125_s1 + $0x110] sm:$0xff]  ;;  %v828_v52 = vld [vmem:[%s1125_s1 + $0x108] sm:$0xff] }
  0x1b   :  { %441 = vmatpush.bf16.msra.mxu1 %v804_v25  ;;  %v837_v51 = vld [vmem:[%s1125_s1 + $0x150] sm:$0xff]  ;;  %v836_v53 = vld [vmem:[%s1125_s1 + $0x148] sm:$0xff]  ;;  %v827_v54 = vld [vmem:[%s1125_s1 + $0x100] sm:$0xff]  ;;  %v518_v24 = vand.u32 127, %v517_v23 }
  0x1c   :  { %454 = vmatpush.bf16.msra.mxu2 %v812_v26  ;;  %v835_v55 = vld [vmem:[%s1125_s1 + $0x140] sm:$0xff]  ;;  %v27_v57 = vld [vmem:[%s1124_s0 + $0x28] sm:$0xff] }
  0x1d   :  { %467 = vmatpush.bf16.msra.mxu3 %v820_v28  ;;  %v26_v56 = vld [vmem:[%s1124_s0 + $0x20] sm:$0xff]  ;;  %v33_v59 = vpack.c.bf16 %v27_v57, %v27_v57 }
  0x1e   :  { %429 = vmatpush.bf16.msra.mxu0 %v795_v27  ;;  %v32_v58 = vpack.c.bf16 %v26_v56, %v26_v56  ;;  %v852_v3 = vld [vmem:[%s1126_s2] ss:$0 sm:$0xff]  ;;  %s903_s2 = smov [#allocation5]  }
  0x1f   :  { %442 = vmatpush.bf16.msra.mxu1 %v803_v29  ;;  %v516_v17 = vld [vmem:[%s1127_s3] sm:$0xff]  ;;  %s582_s3 = sshll.u32 %s903_s2, 4  ;;  %s583_s3 = int_to_ptr.vmem [resolvable:$true] %s582_s3 }
  0x20   :  { %455 = vmatpush.bf16.msra.mxu2 %v811_v34 }
  0x21   :  { %430 = vmatmul.bf16.vlgmr.msra.gmra.mxu0 %v28_v35  ;;  %468 = vmatpush.bf16.msra.mxu3 %v819_v38 }
  0x22   :  { %474 = vmatpush.bf16.msrb.mxu0 %v834_v32  ;;  %443 = vmatmul.bf16.vlgmr.msra.gmra.mxu1 %v29_v36 }
  0x23   :  { %487 = vmatpush.bf16.msrb.mxu1 %v842_v33  ;;  %456 = vmatmul.bf16.vlgmr.msra.gmra.mxu2 %v30_v42 }
  0x24   :  { %469 = vmatmul.bf16.vlgmr.msra.gmra.mxu3 %v31_v43 }
  0x26   :  { %475 = vmatpush.bf16.msrb.mxu0 %v833_v40 }
  0x27   :  { %488 = vmatpush.bf16.msrb.mxu1 %v841_v41  ;;  %v902_v41 = vmov 8.0  }
  0x2a   :  { %476 = vmatpush.bf16.msrb.mxu0 %v832_v44 }
  0x2b   :  { %489 = vmatpush.bf16.msrb.mxu1 %v840_v45 }
  0x2e   :  { %477 = vmatpush.bf16.msrb.mxu0 %v831_v46 }
  0x2f   :  { %490 = vmatpush.bf16.msrb.mxu1 %v839_v47 }
  0x32   :  { %478 = vmatpush.bf16.msrb.mxu0 %v830_v48 }
  0x33   :  { %491 = vmatpush.bf16.msrb.mxu1 %v838_v49 }
  0x36   :  { %479 = vmatpush.bf16.msrb.mxu0 %v829_v50 }
  0x37   :  { %492 = vmatpush.bf16.msrb.mxu1 %v837_v51 }
  0x3a   :  { %480 = vmatpush.bf16.msrb.mxu0 %v828_v52 }
  0x3b   :  { %493 = vmatpush.bf16.msrb.mxu1 %v836_v53 }
  0x3e   :  { %481 = vmatpush.bf16.msrb.mxu0 %v827_v54 }
  0x3f   :  { %494 = vmatpush.bf16.msrb.mxu1 %v835_v55 }
  0x41   :  { %482 = vmatmul.bf16.vlgmr.msrb.gmra.mxu0 %v32_v58 }
  0x42   :  { %495 = vmatmul.bf16.vlgmr.msrb.gmra.mxu1 %v33_v59 }
  0x9e   :  { %v431_v60 = vpop.f32.mrf.mxu0 }
  0x9f   :  { %v444_v61 = vpop.f32.mrf.mxu1  ;;  %v432_v4 = vadd.f32 %v852_v3, %v431_v60 }
  0xa1   :  { %v445_v7 = vadd.f32 %v444_v61, %v432_v4 }
  0xa6   :  { %v433_v63 = vpop.f32.mrf.mxu0  ;;  %v457_v1 = vpop.f32.mrf.mxu2 }
  0xa7   :  { %v446_v0 = vpop.f32.mrf.mxu1  ;;  %v470_v2 = vpop.f32.mrf.mxu3  ;;  %v458_v8 = vadd.f32 %v457_v1, %v445_v7 }
  0xa9   :  { %v471_v9 = vadd.f32 %v470_v2, %v458_v8 }
  0xae   :  { %v459_v5 = vpop.f32.mrf.mxu2 }
  0xaf   :  { %v472_v6 = vpop.f32.mrf.mxu3 }
  0xbe   :  { %v483_v10 = vpop.f32.mrf.mxu0 }
  0xbf   :  { %v496_v11 = vpop.f32.mrf.mxu1  ;;  %v484_v12 = vadd.f32 %v483_v10, %v471_v9 }
  0xc1   :  { %v497_v13 = vadd.f32 %v496_v11, %v484_v12 }
  0xc3   :  { %v501_v14 = vsel %vm500_vm0, %v497_v13, -inf }
  0xc4   :  { %502 = vmax.xlane.f32.xlu0 %v501_v14 }
  0xc6   :  { %v485_v15 = vpop.f32.mrf.mxu0 }
  0xc7   :  { %v498_v16 = vpop.f32.mrf.mxu1 }
  0xd8   :  { %520 = vperm.xlu0 %851, %v516_v17  }
 0x137   :  { %v503_v18 = vpop.xlane.xlu0 %502 }
 0x138   :  { %v504_v19 = vsub.f32 %v497_v13, %v503_v18  ;;  %vm550_vm2 = vcmp.ge.f32.partialorder %v497_v13, %v503_v18 }
 0x139   :  { %v551_v35 = vsel %vm550_vm2, %v518_v24, 32 }
 0x13a   :  { %v505_v20 = vmul.f32 1.442695, %v504_v19  ;;  %v552_v38 = vsel %vm500_vm0, %v551_v35, 2147483647 }
 0x13b   :  { %v554_v39 = vshra.s32 %v552_v38, 16  ;;  %v553_v49 = vand.u32 65535, %v552_v38 }
 0x13c   :  { %853 = vpow2.f32 %v505_v20 }
 0x13d   :  { %v556_v40 = vcvt.s32.f32 %v554_v39  ;;  %v555_v54 = vcvt.s32.f32 %v553_v49 }
 0x142   :  { %v854_v21 = vpop.eup %853 }
 0x143   :  { %v507_v22 = vsel %vm500_vm0, %v854_v21, 0.0 }
 0x144   :  { %508 = vadd.xlane.f32.xlu1 %v507_v22 }
 0x14a   :  { %v521_v25 = vpop.permute.xlu0 %520 }
 0x14b   :  { %vm522_vm1 = vcmp.eq.s32.totalorder %v518_v24, %v521_v25 }
 0x14c   :  { %v523_v26 = vsel %vm522_vm1, %v497_v13, 0.0 }
 0x14d   :  { %v524_v27 = vsel %vm500_vm0, %v523_v26, 0.0 }
 0x14e   :  { %525 = vadd.xlane.f32.xlu1 %v524_v27 }
 0x1b7   :  { %v509_v28 = vpop.xlane.xlu1 %508 }
 0x1b8   :  { %855 = vrcp.f32 %v509_v28 }
 0x1b9   :  { %857 = vlog2.f32 %v509_v28 }
 0x1ba   :  { %859 = vrcp.f32 %v902_v41 }
 0x1be   :  { %v856_v29 = vpop.eup %855 }
 0x1bf   :  { %v858_v30 = vpop.eup %857  ;;  %v511_v31 = vmul.f32 %v856_v29, %v854_v21 }
 0x1c0   :  { %v514_v32 = vmul.f32 0.6931472, %v858_v30  ;;  %v860_v42 = vpop.eup %859 }
 0x1c1   :  { %v526_v33 = vpop.xlane.xlu1 %525  ;;  %512 = vst.msk [vmem:[#allocation5] sm:$0xff] %vm500_vm0, %v511_v31  ;;  %v540_v43 = vmul.f32 8.0, %v860_v42  ;;  %vm544_vm4 = vweird.f32 %v860_v42 }
 0x1c2   :  { %v515_v34 = vadd.f32 %v514_v32, %v503_v18  ;;  %587 = dma.vmem_to_hbm [thread:$0]  %s583_s3, 128, %s585_s13, [#allocation3]  }
 0x1c3   :  { %v541_v44 = vsub.f32 1.0, %v540_v43 }
 0x1c4   :  { %v527_v36 = vsub.f32 %v515_v34, %v526_v33 }
 0x1c5   :  { %v542_v48 = vmul.f32 %v860_v42, %v541_v44 }
 0x1c6   :  { %v529_v37 = vsel %vm528_vm3, %v527_v36, 0.0 }
 0x1c7   :  { %530 = vadd.xlane.f32.xlu2 %v529_v37  ;;  %v543_v52 = vadd.f32 %v860_v42, %v542_v48 }
 0x1c9   :  { %v545_v58 = vsel %vm544_vm4, %v860_v42, %v543_v52 }
 0x1cf   :  { %557 = vmin.xlane.f32.xlu2 %v556_v40 }
 0x23a   :  { %v531_v45 = vpop.xlane.xlu2 %530 }
 0x23b   :  { %v532_v46 = vrot.slane %v531_v45, 4 }
 0x23d   :  { %v533_v47 = vadd.f32 %v532_v46, %v531_v45 }
 0x23f   :  { %v534_v50 = vrot.slane %v533_v47, 2 }
 0x241   :  { %v535_v51 = vadd.f32 %v534_v50, %v533_v47 }
 0x242   :  { %v558_v53 = vpop.xlane.xlu2 %557 }
 0x243   :  { %vm559_vm5 = vcmp.eq.f32.partialorder %v556_v40, %v558_v53  ;;  %v536_v55 = vrot.slane %v535_v51, 1  ;;  %v564_v59 = vcvt.f32.s32 %v558_v53 }
 0x244   :  { %v560_v56 = vsel %vm559_vm5, %v555_v54, inf }
 0x245   :  { %561 = vmin.xlane.f32.xlu1 %v560_v56  ;;  %v537_v57 = vadd.f32 %v536_v55, %v535_v51  ;;  %v565_v61 = vshll.u32 %v564_v59, 16 }
 0x247   :  { %843 = vpush %v537_v57 }
 0x248   :  { %845 = vpush %v545_v58 }
 0x278   :  { %s844_s16 = spop %843 }
 0x279   :  { %s846_s17 = spop %845 }
 0x27a   :  { %s547_s18 = smul.f32 %s846_s17, %s844_s16 }
 0x27c   :  { %549 = sst [smem:[#allocation2]] %s547_s18 }
 0x27d   :  { %576 = dma.smem_to_hbm %s904_s19, 16, %s574_s5, [#allocation4]  }
 0x2b8   :  { %v562_v60 = vpop.xlane.xlu1 %561 }
 0x2b9   :  { %v563_v62 = vcvt.f32.s32 %v562_v60 }
 0x2bb   :  { %v566_v63 = vadd.s32 %v565_v61, %v563_v62 }
 0x2bd   :  { %567 = vst.msk [vmem:[%s1130_s6] sm:$0xff] %vm528_vm3, %v566_v63 }
 0x2be   :  { %897 = dma.done.wait [#allocation4], 16  }
 0x2bf   :  { %898 = vsyncadd [#allocation4], 4294967280 }
 0x2c0   :  { %899 = dma.done.wait [#allocation3], 128  }
 0x2c1   :  { %900 = vsyncadd [#allocation3], 4294967168 }
 0x2c2   :  { %600 = sfence }
 0x2c3   :  { %601 = vsyncpa [#allocation3], 1 }
 0x2c4   :  { %602 = vsyncpa [#allocation4], 1 }

</bundles_post_ra>
